<compile_context>
chip_gen: v5e
topology: v5e:2x2
jax: 0.10.0
libtpu: 0.0.40
codegen_flags: <defaults>
</compile_context>

<pallas_src>
import functools

import jax
import jax.numpy as jnp
import numpy as np
from jax.experimental import pallas as pl
from jax.experimental.pallas import tpu as pltpu


# ----------------------------- kernel --------------------------------------- #

def _shift_cols(v, off):
    """t[:, q] = v[:, q + off] if 0 <= q + off < M else 0   (static off)."""
    if off == 0:
        return v
    c, m = v.shape
    zeros = jnp.zeros((c, abs(off)), v.dtype)
    if off > 0:
        return jnp.concatenate([v[:, off:], zeros], axis=1)
    return jnp.concatenate([zeros, v[:, :m + off]], axis=1)


def _conv_bn_silu_kernel(x_ref, w_ref, b_ref, m_ref, o_ref, *, k, pad, width):
    """Fused kxk conv (stride 1, pad k//2) + folded-BN bias + SiLU, one image.

    x_ref: (1, Cin, M)        f32, M = H*W (spatial flattened, lane axis)
    w_ref: (Cout, k*k*Cin)    bf16, BN scale already folded in
    b_ref: (Cout, 1)          f32 folded BN bias
    m_ref: (k, M)             f32 {0,1} per-column validity mask for each kx tap
    o_ref: (1, Cout, M)       output (lane-dense: M is a multiple of 128)
    """
    x = x_ref[0]                    # (Cin, M) f32
    xmask = m_ref[...]              # (k, M)   f32

    # Build the im2col patch matrix (k*k*Cin, M) with static lane shifts.
    # For tap (ky, kx): patch row = x[ci, q + (ky-pad)*W + (kx-pad)], zeroed
    # where the horizontal offset falls outside the row (zero padding).
    taps = []
    for ky in range(k):
        for kx in range(k):
            off = (ky - pad) * width + (kx - pad)
            t = _shift_cols(x, off)
            if kx != pad:
                t = t * xmask[kx:kx + 1, :]
            taps.append(t)
    patches = taps[0] if len(taps) == 1 else jnp.concatenate(taps, axis=0)
    patches = patches.astype(w_ref.dtype)            # bf16 MXU operand

    # Single matmul over K = k*k*Cin, f32 accumulation.
    acc = jnp.dot(w_ref[...], patches, preferred_element_type=jnp.float32)

    # Folded-BN bias + SiLU (all f32).
    y = acc + b_ref[...]
    sig = pl.reciprocal(1.0 + jnp.exp(-y), approx=True)
    o_ref[0] = (y * sig).astype(o_ref.dtype)


# ----------------------------- wrapper --------------------------------------- #

def conv_bn_silu(x, params, eps=1e-3):
    """Conv.forward:  SiLU(BN(Conv2d(x)))  with k odd, s=1, p=k//2, g=1, d=1.

    x: (N, Cin, H, W) float32 NCHW.  Returns (N, Cout, H, W) float32.
    params: {"w": (Cout,Cin,k,k), "gamma","beta","mean","var": (Cout,)}
    """
    w = params["w"]
    n, cin, h, wdt = x.shape
    cout, cin2, k, k2 = w.shape
    assert cin == cin2 and k == k2 and k % 2 == 1, "only odd k, groups=1 supported"
    pad = k // 2
    m = h * wdt

    # Fold BN (eval mode) into the conv weights / per-channel bias.
    scale = params["gamma"] / jnp.sqrt(params["var"] + eps)
    w_f = w * scale[:, None, None, None]
    bias = (params["beta"] - params["mean"] * scale).reshape(cout, 1)
    bias = bias.astype(jnp.float32)

    # (Cout, Cin, k, k) -> (Cout, k*k*Cin); rows ordered (ky, kx) major, ci minor
    # to match the in-kernel patch construction.  bf16 for the MXU.
    w_mat = jnp.transpose(w_f, (0, 2, 3, 1)).reshape(cout, k * k * cin)
    w_mat = w_mat.astype(jnp.bfloat16)

    # Static per-column validity masks (one per horizontal tap offset).
    colnp = np.arange(m) % wdt
    xmask = np.stack(
        [((colnp + (kx - pad)) >= 0) & ((colnp + (kx - pad)) < wdt)
         for kx in range(k)]
    ).astype(np.float32)                                # (k, M)
    xmask = jnp.asarray(xmask)

    x_flat = x.reshape(n, cin, m)                       # metadata-only reshape

    kern = functools.partial(_conv_bn_silu_kernel, k=k, pad=pad, width=wdt)
    out = pl.pallas_call(
        kern,
        out_shape=jax.ShapeDtypeStruct((n, cout, m), x.dtype),
        grid_spec=pltpu.PrefetchScalarGridSpec(
            num_scalar_prefetch=0,
            grid=(n,),
            in_specs=[
                pl.BlockSpec((1, cin, m), lambda b: (b, 0, 0)),
                pl.BlockSpec((cout, k * k * cin), lambda b: (0, 0)),
                pl.BlockSpec((cout, 1), lambda b: (0, 0)),
                pl.BlockSpec((k, m), lambda b: (0, 0)),
            ],
            out_specs=pl.BlockSpec((1, cout, m), lambda b: (b, 0, 0)),
        ),
        compiler_params=pltpu.CompilerParams(
            dimension_semantics=("parallel",)),
    )(x_flat, w_mat, bias, xmask)
    return out.reshape(n, cout, h, wdt)


# ----------------------------- params & reference ---------------------------- #

def make_conv_params(key, cin, cout, k):
    """Deterministic synthetic Conv2d(no-bias) + BatchNorm2d(eval) parameters."""
    kw, kg, kb, km, kv = jax.random.split(key, 5)
    w = jax.random.normal(kw, (cout, cin, k, k), jnp.float32) / np.sqrt(cin * k * k)
    gamma = 1.0 + 0.1 * jax.random.normal(kg, (cout,), jnp.float32)
    beta = 0.1 * jax.random.normal(kb, (cout,), jnp.float32)
    mean = 0.1 * jax.random.normal(km, (cout,), jnp.float32)
    var = jnp.abs(jax.random.normal(kv, (cout,), jnp.float32)) + 0.5
    return {"w": w, "gamma": gamma, "beta": beta, "mean": mean, "var": var}


def _ref_conv_bn_silu(x, params, eps=1e-3):
    """Pure-JAX f32 reference matching Conv.forward (NCHW)."""
    w = params["w"]
    k = w.shape[-1]
    p = k // 2
    y = jax.lax.conv_general_dilated(
        x, w, window_strides=(1, 1), padding=[(p, p), (p, p)],
        dimension_numbers=("NCHW", "OIHW", "NCHW"))
    scale = params["gamma"] / jnp.sqrt(params["var"] + eps)
    bias = params["beta"] - params["mean"] * scale
    y = y * scale[None, :, None, None] + bias[None, :, None, None]
    return y * jax.nn.sigmoid(y)


# ----------------------------- main ------------------------------------------ #

if __name__ == "__main__":
    key = jax.random.PRNGKey(0)
    k_x, k_p3, k_p1 = jax.random.split(key, 3)

    N, C1, H, W = 2, 16, 16, 16          # small NCHW input
    C2 = 32

    x = jax.random.normal(k_x, (N, C1, H, W), jnp.float32)
    p3 = make_conv_params(k_p3, C1, C2, 3)   # Conv(c1=16, c2=32, k=3)
    p1 = make_conv_params(k_p1, C1, C2, 1)   # Conv(c1=16, c2=32, k=1)

    fwd = jax.jit(conv_bn_silu)
    out3 = jax.block_until_ready(fwd(x, p3))
    out1 = jax.block_until_ready(fwd(x, p1))

    ref3 = jax.block_until_ready(_ref_conv_bn_silu(x, p3))
    ref1 = jax.block_until_ready(_ref_conv_bn_silu(x, p1))

    assert out3.shape == (N, C2, H, W), out3.shape
    assert out1.shape == (N, C2, H, W), out1.shape
    assert np.all(np.isfinite(np.asarray(out3)))
    assert np.all(np.isfinite(np.asarray(out1)))
    np.testing.assert_allclose(np.asarray(out3), np.asarray(ref3), rtol=5e-2, atol=5e-2)
    np.testing.assert_allclose(np.asarray(out1), np.asarray(ref1), rtol=5e-2, atol=5e-2)

    print("KERNEL_OK")
</pallas_src>

<mosaic_0001>
module attributes {stable_mosaic.version = 11 : i64} {
  func.func @_conv_bn_silu_kernel(%arg0: i32, %arg1: memref<1x16x256xf32, #tpu.memory_space<vmem>>, %arg2: memref<32x144xbf16, #tpu.memory_space<vmem>>, %arg3: memref<32x1xf32, #tpu.memory_space<vmem>>, %arg4: memref<3x256xf32, #tpu.memory_space<vmem>>, %arg5: memref<1x32x256xf32, #tpu.memory_space<vmem>>) attributes {dimension_semantics = [#tpu.dimension_semantics<parallel>], iteration_bounds = array<i64: 2>, scalar_prefetch = 0 : i64, scratch_operands = 0 : i64, tpu.core_type = #tpu.core_type<tc>, window_params = [{transform_indices = @transform_0, window_bounds = array<i64: 1, 16, 256>}, {pipeline_mode = #tpu.pipeline_mode<synchronous>, transform_indices = @transform_1, window_bounds = array<i64: 32, 144>}, {pipeline_mode = #tpu.pipeline_mode<synchronous>, transform_indices = @transform_2, window_bounds = array<i64: 32, 1>}, {pipeline_mode = #tpu.pipeline_mode<synchronous>, transform_indices = @transform_3, window_bounds = array<i64: 3, 256>}, {transform_indices = @transform_4, window_bounds = array<i64: 1, 32, 256>}]} {
    %c0 = arith.constant 0 : index
    %c0_0 = arith.constant 0 : index
    %c0_1 = arith.constant 0 : index
    %0 = vector.load %arg1[%c0, %c0_0, %c0_1] : memref<1x16x256xf32, #tpu.memory_space<vmem>>, vector<1x16x256xf32>
    %1 = vector.shape_cast %0 : vector<1x16x256xf32> to vector<16x256xf32>
    %c0_2 = arith.constant 0 : index
    %c0_3 = arith.constant 0 : index
    %2 = vector.load %arg4[%c0_2, %c0_3] : memref<3x256xf32, #tpu.memory_space<vmem>>, vector<3x256xf32>
    %cst = arith.constant 0.000000e+00 : f32
    %3 = vector.broadcast %cst : f32 to vector<16x17xf32>
    %4 = vector.extract_strided_slice %1 {offsets = [0, 0], sizes = [16, 239], strides = [1, 1]} : vector<16x256xf32> to vector<16x239xf32>
    %5 = tpu.concatenate %3, %4 in 1 : vector<16x17xf32>, vector<16x239xf32> -> vector<16x256xf32>
    %6 = vector.extract_strided_slice %2 {offsets = [0, 0], sizes = [1, 256], strides = [1, 1]} : vector<3x256xf32> to vector<1x256xf32>
    %7 = vector.broadcast %6 : vector<1x256xf32> to vector<16x256xf32>
    %8 = arith.mulf %5, %7 : vector<16x256xf32>
    %cst_4 = arith.constant 0.000000e+00 : f32
    %9 = vector.broadcast %cst_4 : f32 to vector<16x16xf32>
    %10 = vector.extract_strided_slice %1 {offsets = [0, 0], sizes = [16, 240], strides = [1, 1]} : vector<16x256xf32> to vector<16x240xf32>
    %11 = tpu.concatenate %9, %10 in 1 : vector<16x16xf32>, vector<16x240xf32> -> vector<16x256xf32>
    %cst_5 = arith.constant 0.000000e+00 : f32
    %12 = vector.broadcast %cst_5 : f32 to vector<16x15xf32>
    %13 = vector.extract_strided_slice %1 {offsets = [0, 0], sizes = [16, 241], strides = [1, 1]} : vector<16x256xf32> to vector<16x241xf32>
    %14 = tpu.concatenate %12, %13 in 1 : vector<16x15xf32>, vector<16x241xf32> -> vector<16x256xf32>
    %15 = vector.extract_strided_slice %2 {offsets = [2, 0], sizes = [1, 256], strides = [1, 1]} : vector<3x256xf32> to vector<1x256xf32>
    %16 = vector.broadcast %15 : vector<1x256xf32> to vector<16x256xf32>
    %17 = arith.mulf %14, %16 : vector<16x256xf32>
    %cst_6 = arith.constant 0.000000e+00 : f32
    %18 = vector.broadcast %cst_6 : f32 to vector<16x1xf32>
    %19 = vector.extract_strided_slice %1 {offsets = [0, 0], sizes = [16, 255], strides = [1, 1]} : vector<16x256xf32> to vector<16x255xf32>
    %20 = tpu.concatenate %18, %19 in 1 : vector<16x1xf32>, vector<16x255xf32> -> vector<16x256xf32>
    %21 = vector.extract_strided_slice %2 {offsets = [0, 0], sizes = [1, 256], strides = [1, 1]} : vector<3x256xf32> to vector<1x256xf32>
    %22 = vector.broadcast %21 : vector<1x256xf32> to vector<16x256xf32>
    %23 = arith.mulf %20, %22 : vector<16x256xf32>
    %cst_7 = arith.constant 0.000000e+00 : f32
    %24 = vector.broadcast %cst_7 : f32 to vector<16x1xf32>
    %25 = vector.extract_strided_slice %1 {offsets = [0, 1], sizes = [16, 255], strides = [1, 1]} : vector<16x256xf32> to vector<16x255xf32>
    %26 = tpu.concatenate %25, %24 in 1 : vector<16x255xf32>, vector<16x1xf32> -> vector<16x256xf32>
    %27 = vector.extract_strided_slice %2 {offsets = [2, 0], sizes = [1, 256], strides = [1, 1]} : vector<3x256xf32> to vector<1x256xf32>
    %28 = vector.broadcast %27 : vector<1x256xf32> to vector<16x256xf32>
    %29 = arith.mulf %26, %28 : vector<16x256xf32>
    %cst_8 = arith.constant 0.000000e+00 : f32
    %30 = vector.broadcast %cst_8 : f32 to vector<16x15xf32>
    %31 = vector.extract_strided_slice %1 {offsets = [0, 15], sizes = [16, 241], strides = [1, 1]} : vector<16x256xf32> to vector<16x241xf32>
    %32 = tpu.concatenate %31, %30 in 1 : vector<16x241xf32>, vector<16x15xf32> -> vector<16x256xf32>
    %33 = vector.extract_strided_slice %2 {offsets = [0, 0], sizes = [1, 256], strides = [1, 1]} : vector<3x256xf32> to vector<1x256xf32>
    %34 = vector.broadcast %33 : vector<1x256xf32> to vector<16x256xf32>
    %35 = arith.mulf %32, %34 : vector<16x256xf32>
    %cst_9 = arith.constant 0.000000e+00 : f32
    %36 = vector.broadcast %cst_9 : f32 to vector<16x16xf32>
    %37 = vector.extract_strided_slice %1 {offsets = [0, 16], sizes = [16, 240], strides = [1, 1]} : vector<16x256xf32> to vector<16x240xf32>
    %38 = tpu.concatenate %37, %36 in 1 : vector<16x240xf32>, vector<16x16xf32> -> vector<16x256xf32>
    %cst_10 = arith.constant 0.000000e+00 : f32
    %39 = vector.broadcast %cst_10 : f32 to vector<16x17xf32>
    %40 = vector.extract_strided_slice %1 {offsets = [0, 17], sizes = [16, 239], strides = [1, 1]} : vector<16x256xf32> to vector<16x239xf32>
    %41 = tpu.concatenate %40, %39 in 1 : vector<16x239xf32>, vector<16x17xf32> -> vector<16x256xf32>
    %42 = vector.extract_strided_slice %2 {offsets = [2, 0], sizes = [1, 256], strides = [1, 1]} : vector<3x256xf32> to vector<1x256xf32>
    %43 = vector.broadcast %42 : vector<1x256xf32> to vector<16x256xf32>
    %44 = arith.mulf %41, %43 : vector<16x256xf32>
    %45 = tpu.concatenate %8, %11, %17, %23, %1, %29, %35, %38, %44 in 0 : vector<16x256xf32>, vector<16x256xf32>, vector<16x256xf32>, vector<16x256xf32>, vector<16x256xf32>, vector<16x256xf32>, vector<16x256xf32>, vector<16x256xf32>, vector<16x256xf32> -> vector<144x256xf32>
    %46 = arith.truncf %45 : vector<144x256xf32> to vector<144x256xbf16>
    %c0_11 = arith.constant 0 : index
    %c0_12 = arith.constant 0 : index
    %47 = vector.load %arg2[%c0_11, %c0_12] : memref<32x144xbf16, #tpu.memory_space<vmem>>, vector<32x144xbf16>
    %cst_13 = arith.constant dense<0.000000e+00> : vector<32x256xf32>
    %48 = tpu.matmul %47, %46, %cst_13 {dimension_numbers = #tpu.dot_dimension_numbers<[1], [0], [0], [1], [0, 0, 1, 1], [], []>} : vector<32x144xbf16>, vector<144x256xbf16>, vector<32x256xf32> -> vector<32x256xf32>
    %c0_14 = arith.constant 0 : index
    %c0_15 = arith.constant 0 : index
    %49 = vector.load %arg3[%c0_14, %c0_15] : memref<32x1xf32, #tpu.memory_space<vmem>>, vector<32x1xf32>
    %50 = vector.broadcast %49 : vector<32x1xf32> to vector<32x256xf32>
    %51 = arith.addf %48, %50 : vector<32x256xf32>
    %cst_16 = arith.constant 0.000000e+00 : f32
    %52 = vector.broadcast %cst_16 : f32 to vector<32x256xf32>
    %53 = arith.subf %52, %51 : vector<32x256xf32>
    %54 = math.exp %53 : vector<32x256xf32>
    %cst_17 = arith.constant 1.000000e+00 : f32
    %55 = vector.broadcast %cst_17 : f32 to vector<32x256xf32>
    %56 = arith.addf %55, %54 : vector<32x256xf32>
    %57 = tpu.reciprocal %56 {approx = true} : vector<32x256xf32> -> vector<32x256xf32>
    %58 = arith.mulf %51, %57 : vector<32x256xf32>
    %c0_18 = arith.constant 0 : index
    %c0_19 = arith.constant 0 : index
    %c0_20 = arith.constant 0 : index
    %59 = vector.load %arg5[%c0_18, %c0_19, %c0_20] : memref<1x32x256xf32, #tpu.memory_space<vmem>>, vector<1x32x256xf32>
    %60 = vector.shape_cast %59 : vector<1x32x256xf32> to vector<32x256xf32>
    %61 = vector.shape_cast %58 : vector<32x256xf32> to vector<1x32x256xf32>
    tpu.vector_store %arg5[%c0_18, %c0_19, %c0_20], %61 {strides = array<i32>} : memref<1x32x256xf32, #tpu.memory_space<vmem>>, vector<1x32x256xf32>,
    return
  }
  func.func @transform_0(%arg0: i32) -> (i32, i32, i32) {
    %c0_i32 = arith.constant 0 : i32
    %c0_i32_0 = arith.constant 0 : i32
    %c0_i32_1 = arith.constant 0 : i32
    return %arg0, %c0_i32, %c0_i32_0 : i32, i32, i32
  }
  func.func @transform_1(%arg0: i32) -> (i32, i32) {
    %c0_i32 = arith.constant 0 : i32
    %c0_i32_0 = arith.constant 0 : i32
    %c0_i32_1 = arith.constant 0 : i32
    return %c0_i32, %c0_i32_0 : i32, i32
  }
  func.func @transform_2(%arg0: i32) -> (i32, i32) {
    %c0_i32 = arith.constant 0 : i32
    %c0_i32_0 = arith.constant 0 : i32
    %c0_i32_1 = arith.constant 0 : i32
    return %c0_i32, %c0_i32_0 : i32, i32
  }
  func.func @transform_3(%arg0: i32) -> (i32, i32) {
    %c0_i32 = arith.constant 0 : i32
    %c0_i32_0 = arith.constant 0 : i32
    %c0_i32_1 = arith.constant 0 : i32
    return %c0_i32, %c0_i32_0 : i32, i32
  }
  func.func @transform_4(%arg0: i32) -> (i32, i32, i32) {
    %c0_i32 = arith.constant 0 : i32
    %c0_i32_0 = arith.constant 0 : i32
    %c0_i32_1 = arith.constant 0 : i32
    return %arg0, %c0_i32, %c0_i32_0 : i32, i32, i32
  }
}

</mosaic_0001>

<bundles_post_ra>
// kernel: conv_bn_silu.1
= control target key start
LH: loop header
LB: loop body
LE: loop exit
PB: predicated region body
PF: predicated region fallthrough
CT: control target
= control target key end

     0   :  { %s797_s15 = smov 0   ;;  %s977_s0 = inlined_call_operand.vmem [shape: f32[2,16,256], index: 0, kind: input, shape index: {}]   ;;  %s978_s1 = inlined_call_operand.vmem [shape: bf16[32,144], index: 1, kind: input, shape index: {}]   ;;  %s979_s2 = inlined_call_operand.vmem [shape: f32[32,1], index: 2, kind: input, shape index: {}]   ;;  %s980_s3 = inlined_call_operand.vmem [shape: f32[3,256], index: 3, kind: input, shape index: {}]   ;;  %s981_s4 = inlined_call_operand.vmem [shape: f32[2,32,256], index: 4, kind: output, shape index: {}]  }
   0x1 LB: > { %s638_s16 = sadd.s32 4294967295, %s761_s15   ;;  %p642_p0 = scmp.ge.s32.totalorder %s761_s15, 1  ;;  %s761_s15 = sphi %s797_s15, %s14_s15  }
   0x2   : > { %p162_p1 = scmp.lt.s32.totalorder %s761_s15, 3 }
   0x4   : > { %p163_p2 = pnand %p642_p0, %p162_p1 }
   0x5   : > { %p188_p3 = scmp.lt.s32.totalorder (!%p163_p2), %s638_s16, 1  ;;  %s763_s21 = smov (!%p163_p2), 113  }
   0x6   : > { %166 = sbr.rel (%p163_p2) target bundleno = 387 (0x183), region = 36  ;;  %s764_s22 = smov (!%p163_p2), 127  }
   0x7   : > { %s765_s23 = smov (!%p163_p2), 112   ;;  %s766_s24 = smov (!%p163_p2), 1  }
   0x8   : > { %s767_s25 = smov (!%p163_p2), 15   ;;  %s768_s26 = smov (!%p163_p2), 16  }
   0x9   : > { %s769_s27 = smov (!%p163_p2), 17   ;;  %s770_s28 = smov (!%p163_p2), 111  }
   0xb   : > { %s985_s16 = smov (!%p188_p3, %s638_s16), 1  ;;  %v203_v11 = vld [vmem:[%s980_s3] sm:$0x77]  ;;  %vm351_vm0 = vcmask 916480   ;;  %vm330_vm2 = vcmask 924672   ;;  %vm309_vm3 = vcmask 1039360  }
   0xc   : > { %s677_s17 = sshll.u32 %s985_s16, 5  ;;  %v227_v17 = vperm.slane %v203_v11, 4  ;;  %vm670_vm1 = vmpackc.low %vm351_vm0, %vm351_vm0  ;;  %v271_v21 = vperm.slane %v203_v11, 6  ;;  %v226_v34 = vperm.slane %v203_v11, 0  ;;  %v270_v45 = vperm.slane %v203_v11, 2  ;;  %s678_s5 = sshll.u32 %s985_s16, 6 }
   0xd   : > { %s192_s20 = scalar_lea.vmem %s977_s0, %s677_s17  ;;  %vm288_vm4 = vcmask 7168   ;;  %vm261_vm5 = vcmask 121856   ;;  %vm244_vm6 = vcmask 130048   ;;  %vm216_vm8 = vcmask 138240   ;;  %s964_s8 = scalar_lea.vmem %s981_s4, %s678_s5 }
   0xe   : > { %v811_v0 = vld [vmem:[%s192_s20 + $0x18] sm:$0xff]  ;;  %v813_v1 = vld [vmem:[%s192_s20 + $0x8] sm:$0xff]  ;;  %v819_v3 = vld [vmem:[%s192_s20 + $0x10] sm:$0xff]  ;;  %v854_v24 = vperm.slane %v227_v17, 0  ;;  %v857_v27 = vperm.slane %v271_v21, 2  ;;  %v866_v39 = vperm.slane %v226_v34, 0 }
   0xf   : > { %328 = vrot.lane.b32.xlu1 %v811_v0, %s763_s21  ;;  %v700_v2 = vpack.i.bf16 %v811_v0, %v813_v1  ;;  %307 = vrot.lane.b32.xlu2 %v811_v0, %s764_s22  ;;  %v821_v4 = vld [vmem:[%s192_s20] sm:$0xff]  ;;  %v715_v6 = vpack.i.bf16 %v811_v0, %v819_v3  ;;  %v390_v48 = vpack.c.bf16 %v811_v0, %v813_v1  ;;  %v874_v50 = vperm.slane %v270_v45, 2  ;;  %vm895_vm7 = vmneg %vm244_vm6 }
  0x10   : > { %v705_v5 = vpack.i.bf16 %v819_v3, %v821_v4  ;;  %v710_v7 = vpack.i.bf16 %v813_v1, %v821_v4  ;;  %v389_v60 = vpack.c.bf16 %v819_v3, %v821_v4  ;;  %vm665_vm9 = vmpackc.low %vm895_vm7, %vm895_vm7  ;;  %vm368_vm10 = vcmask 908288  }
  0x11   : > { %701 = vrot.lane.b32.xlu0 %v700_v2, %s765_s23 }
  0x17   : > { %303 = vrot.lane.b32.xlu1 %v813_v1, %s764_s22  ;;  %706 = vrot.lane.b32.xlu2 %v705_v5, %s765_s23 }
  0x19   : > { %324 = vrot.lane.b32.xlu0 %v813_v1, %s763_s21 }
  0x1f   : > { %326 = vrot.lane.b32.xlu1 %v819_v3, %s763_s21  ;;  %301 = vrot.lane.b32.xlu2 %v821_v4, %s764_s22 }
  0x21   : > { %322 = vrot.lane.b32.xlu0 %v821_v4, %s763_s21 }
  0x27   : > { %280 = vrot.lane.b32.xlu1 %v821_v4, %s766_s24  ;;  %282 = vrot.lane.b32.xlu2 %v813_v1, %s766_s24 }
  0x29   : > { %305 = vrot.lane.b32.xlu0 %v819_v3, %s764_s22 }
  0x2f   : > { %286 = vrot.lane.b32.xlu1 %v811_v0, %s766_s24  ;;  %253 = vrot.lane.b32.xlu2 %v821_v4, %s767_s25 }
  0x31   : > { %284 = vrot.lane.b32.xlu0 %v819_v3, %s766_s24 }
  0x37   : > { %257 = vrot.lane.b32.xlu1 %v819_v3, %s767_s25  ;;  %259 = vrot.lane.b32.xlu2 %v811_v0, %s767_s25 }
  0x39   : > { %255 = vrot.lane.b32.xlu0 %v813_v1, %s767_s25 }
  0x3f   : > { %716 = vrot.lane.b32.xlu1 %v715_v6, %s768_s26  ;;  %208 = vrot.lane.b32.xlu2 %v821_v4, %s769_s27 }
  0x41   : > { %711 = vrot.lane.b32.xlu0 %v710_v7, %s768_s26 }
  0x47   : > { %212 = vrot.lane.b32.xlu1 %v819_v3, %s769_s27  ;;  %214 = vrot.lane.b32.xlu2 %v811_v0, %s769_s27 }
  0x49   : > { %210 = vrot.lane.b32.xlu0 %v813_v1, %s769_s27 }
  0x4f   : > { %366 = vrot.lane.b32.xlu1 %v811_v0, %s770_s28  ;;  %360 = vrot.lane.b32.xlu2 %v821_v4, %s770_s28 }
  0x51   : > { %362 = vrot.lane.b32.xlu0 %v813_v1, %s770_s28 }
  0x59   : > { %364 = vrot.lane.b32.xlu0 %v819_v3, %s770_s28 }
  0x69   : > { %v308_v8 = vpop.permute.xlu2 %307 }
  0x6a   : > { %v317_v29 = vsel %vm309_vm3, %v308_v8, 0.0 }
  0x6b   : > { %v321_v35 = vmul.f32 %v317_v29, %v857_v27 }
  0x71   : > { %v707_v9 = vpop.permute.xlu2 %706 }
  0x72   : > { %v709_v12 = vunpack.i.h.bf16 %v707_v9  ;;  %v708_v13 = vunpack.i.l.bf16 %v707_v9 }
  0x79   : > { %v302_v23 = vpop.permute.xlu2 %301 }
  0x81   : > { %v329_v10 = vpop.permute.xlu1 %328  ;;  %v283_v38 = vpop.permute.xlu2 %282 }
  0x82   : > { %v338_v26 = vsel %vm330_vm2, %v329_v10, 0.0 }
  0x83   : > { %v702_v14 = vpop.permute.xlu0 %701  ;;  %v342_v32 = vmul.f32 %v338_v26, %v854_v24 }
  0x84   : > { %v704_v15 = vunpack.i.h.bf16 %v702_v14  ;;  %v703_v16 = vunpack.i.l.bf16 %v702_v14 }
  0x86   : > { %v671_v18 = vpack.c.bf16 %v704_v15, %v703_v16  ;;  %v352_v19 = vsel %vm351_vm0, %v708_v13, %v703_v16  ;;  %v353_v20 = vsel %vm351_vm0, %v709_v12, %v704_v15 }
  0x87   : > { %v395_v22 = vpack.c.bf16 %v353_v20, %v352_v19 }
  0x88   : > { %672 = vmatpush.bf16.msk.msra.mxu2 %vm670_vm1, %v671_v18 }
  0x89   : > { %v304_v25 = vpop.permute.xlu1 %303  ;;  %451 = vmatpush.bf16.msra.mxu0 %v395_v22  ;;  %v254_v52 = vpop.permute.xlu2 %253 }
  0x8a   : > { %v316_v30 = vsel %vm309_vm3, %v304_v25, 0.0  ;;  %v310_v53 = vsel %vm309_vm3, %v302_v23, %v304_v25  ;;  %v268_v9 = vsel %vm261_vm5, 0.0, %v254_v52 }
  0x8b   : > { %v325_v28 = vpop.permute.xlu0 %324  ;;  %v319_v36 = vmul.f32 %v316_v30, %v857_v27  ;;  %v318_v56 = vmul.f32 %v310_v53, %v874_v50  ;;  %v276_v4 = vmul.f32 %v874_v50, %v268_v9  ;;  %v657_v9 = vld [vmem:[%s978_s1 + $0x10] sm:$0xf] }
  0x8c   : > { %v337_v31 = vsel %vm330_vm2, %v325_v28, 0.0 }
  0x8d   : > { %v340_v33 = vmul.f32 %v337_v31, %v854_v24  ;;  %v392_v43 = vpack.c.bf16 %v321_v35, %v319_v36 }
  0x8f   : > { %v394_v37 = vpack.c.bf16 %v342_v32, %v340_v33  ;;  %v403_v32 = vld [vmem:[%s979_s2] sm:$0xff]  ;;  %v771_v33 = vmov 0  }
  0x90   : > { %720 = vset.pattern.permute.xlu1 %v771_v33  ;;  %722 = vset.pattern.permute.xlu0 %v771_v33 }
  0x91   : > { %v327_v40 = vpop.permute.xlu1 %326  ;;  %490 = vmatpush.bf16.msra.mxu2 %v394_v37  ;;  %v260_v0 = vpop.permute.xlu2 %259  ;;  %409 = vperm.xlu1 %720, %v403_v32  }
  0x92   : > { %v332_v41 = vsel %vm330_vm2, %v327_v40, %v329_v10  ;;  %721 = vset.pattern.permute.xlu2 %v771_v33 }
  0x93   : > { %v323_v42 = vpop.permute.xlu0 %322  ;;  %v341_v46 = vmul.f32 %v332_v41, %v866_v39 }
  0x94   : > { %v331_v44 = vsel %vm330_vm2, %v323_v42, %v325_v28 }
  0x95   : > { %v339_v47 = vmul.f32 %v331_v44, %v866_v39  ;;  %491 = vmatpush.bf16.msra.mxu2 %v392_v43 }
  0x97   : > { %v393_v49 = vpack.c.bf16 %v341_v46, %v339_v47 }
  0x99   : > { %452 = vmatpush.bf16.msra.mxu0 %v393_v49  ;;  %v281_v51 = vpop.permute.xlu1 %280  ;;  %492 = vmatpush.bf16.msra.mxu2 %v390_v48  ;;  %v209_v20 = vpop.permute.xlu2 %208 }
  0x9a   : > { %v295_v61 = vsel %vm288_vm4, 0.0, %v281_v51  ;;  %v289_v62 = vsel %vm288_vm4, %v281_v51, %v283_v38  ;;  %v223_v35 = vsel %vm216_vm8, 0.0, %v209_v20  ;;  %v649_v51 = vld [vmem:[%s978_s1] sm:$0xf] }
  0x9b   : > { %v306_v54 = vpop.permute.xlu0 %305  ;;  %v297_v5 = vmul.f32 %v295_v61, %v866_v39  ;;  %v298_v6 = vmul.f32 %v289_v62, %v854_v24  ;;  %v232_v40 = vmul.f32 %v866_v39, %v223_v35  ;;  %v679_v62 = vld [vmem:[%s978_s1 + $0x4] sm:$0xf] }
  0x9c   : > { %v311_v55 = vsel %vm309_vm3, %v306_v54, %v308_v8 }
  0x9d   : > { %v320_v57 = vmul.f32 %v311_v55, %v874_v50 }
  0x9f   : > { %v391_v58 = vpack.c.bf16 %v320_v57, %v318_v56 }
  0xa1   : > { %453 = vmatpush.bf16.msra.mxu0 %v391_v58  ;;  %v287_v59 = vpop.permute.xlu1 %286  ;;  %v215_v38 = vpop.permute.xlu2 %214  ;;  %v405_v58 = vld [vmem:[%s979_s2 + $0x10] sm:$0xff] }
  0xa2   : > { %419 = vperm.xlu0 %722, %v405_v58  }
  0xa3   : > { %v285_v63 = vpop.permute.xlu0 %284 }
  0xa4   : > { %v290_v1 = vsel %vm288_vm4, %v285_v63, %v287_v59  ;;  %v296_v2 = vsel %vm288_vm4, 0.0, %v285_v63  ;;  %v406_v59 = vld [vmem:[%s979_s2 + $0x18] sm:$0xff]  ;;  %v651_v63 = vld [vmem:[%s978_s1 + $0x8] sm:$0xf0] }
  0xa5   : > { %v299_v7 = vmul.f32 %v296_v2, %v866_v39  ;;  %v300_v8 = vmul.f32 %v290_v1, %v854_v24  ;;  %454 = vmatpush.bf16.msra.mxu0 %v389_v60  ;;  %v404_v60 = vld [vmem:[%s979_s2 + $0x8] sm:$0xff]  ;;  %424 = vperm.xlu1 %720, %v406_v59   ;;  %v654_v2 = vor.u32 %v679_v62, %v651_v63 }
  0xa6   : > { %414 = vperm.xlu2 %721, %v404_v60  }
  0xa7   : > { %v387_v10 = vpack.c.bf16 %v299_v7, %v297_v5  ;;  %v388_v3 = vpack.c.bf16 %v300_v8, %v298_v6 }
  0xa9   : > { %455 = vmatpush.bf16.msra.mxu0 %v387_v10  ;;  %493 = vmatpush.bf16.msra.mxu2 %v388_v3  ;;  %v258_v11 = vpop.permute.xlu1 %257  ;;  %v682_v10 = vld [vmem:[%s978_s1 + $0x14] sm:$0xf0] }
  0xaa   : > { %v269_v12 = vsel %vm261_vm5, 0.0, %v258_v11  ;;  %v263_v13 = vsel %vm261_vm5, %v258_v11, %v260_v0  ;;  %v361_v0 = vpop.permute.xlu2 %360  ;;  %v681_v11 = vld [vmem:[%s978_s1 + $0x14] sm:$0xf] }
  0xab   : > { %v278_v14 = vmul.f32 %v874_v50, %v269_v12  ;;  %v256_v15 = vpop.permute.xlu0 %255  ;;  %v279_v16 = vmul.f32 %v857_v27, %v263_v13 }
  0xac   : > { %v262_v17 = vsel %vm261_vm5, %v254_v52, %v256_v15  ;;  %v680_v52 = vld [vmem:[%s978_s1 + $0x4] sm:$0xf0] }
  0xad   : > { %v277_v18 = vmul.f32 %v857_v27, %v262_v17  ;;  %v385_v19 = vpack.c.bf16 %v278_v14, %v276_v4  ;;  %v658_v4 = vor.u32 %v682_v10, %v657_v9 }
  0xaf   : > { %456 = vmatpush.bf16.msra.mxu0 %v385_v19  ;;  %v386_v21 = vpack.c.bf16 %v279_v16, %v277_v18 }
  0xb1   : > { %494 = vmatpush.bf16.msra.mxu2 %v386_v21  ;;  %v717_v22 = vpop.permute.xlu1 %716 }
  0xb2   : > { %v719_v23 = vunpack.i.h.bf16 %v717_v22  ;;  %v718_v25 = vunpack.i.l.bf16 %v717_v22 }
  0xb3   : > { %v712_v28 = vpop.permute.xlu0 %711 }
  0xb4   : > { %v714_v29 = vunpack.i.h.bf16 %v712_v28  ;;  %v713_v30 = vunpack.i.l.bf16 %v712_v28  ;;  %v246_v31 = vsel %vm244_vm6, %v718_v25, %v719_v23 }
  0xb6   : > { %v666_v34 = vpack.c.bf16 %v718_v25, %v713_v30  ;;  %v245_v36 = vsel %vm244_vm6, %v713_v30, %v714_v29 }
  0xb7   : > { %v384_v37 = vpack.c.bf16 %v246_v31, %v245_v36 }
  0xb8   : > { %667 = vmatpush.bf16.msk.msra.mxu0 %vm665_vm9, %v666_v34 }
  0xb9   : > { %495 = vmatpush.bf16.msra.mxu2 %v384_v37  ;;  %v213_v41 = vpop.permute.xlu1 %212 }
  0xba   : > { %v224_v42 = vsel %vm216_vm8, 0.0, %v213_v41  ;;  %v218_v43 = vsel %vm216_vm8, %v213_v41, %v215_v38 }
  0xbb   : > { %v234_v44 = vmul.f32 %v866_v39, %v224_v42  ;;  %v211_v45 = vpop.permute.xlu0 %210  ;;  %v235_v46 = vmul.f32 %v854_v24, %v218_v43  ;;  %v650_v39 = vor.u32 %v680_v52, %v649_v51 }
  0xbc   : > { %v217_v47 = vsel %vm216_vm8, %v209_v20, %v211_v45 }
  0xbd   : > { %v233_v48 = vmul.f32 %v854_v24, %v217_v47  ;;  %v381_v49 = vpack.c.bf16 %v234_v44, %v232_v40 }
  0xbf   : > { %458 = vmatpush.bf16.msra.mxu0 %v381_v49  ;;  %v382_v53 = vpack.c.bf16 %v235_v46, %v233_v48 }
  0xc1   : > { %496 = vmatpush.bf16.msra.mxu2 %v382_v53  ;;  %v367_v54 = vpop.permute.xlu1 %366 }
  0xc2   : > { %v376_v55 = vsel %vm368_vm10, %v367_v54, 0.0  ;;  %459 = vmatmul.bf16.vlgmr.msra.gmra.mxu0 %v650_v39 }
  0xc3   : > { %v363_v56 = vpop.permute.xlu0 %362  ;;  %v380_v24 = vmul.f32 %v376_v55, %v857_v27 }
  0xc4   : > { %v375_v57 = vsel %vm368_vm10, %v363_v56, 0.0  ;;  %497 = vmatmul.bf16.vlgmr.msra.gmra.mxu2 %v650_v39  ;;  %v369_v5 = vsel %vm368_vm10, %v361_v0, %v363_v56 }
  0xc5   : > { %v378_v61 = vmul.f32 %v375_v57, %v857_v27  ;;  %v377_v7 = vmul.f32 %v369_v5, %v874_v50 }
  0xc7   : > { %v398_v1 = vpack.c.bf16 %v380_v24, %v378_v61 }
  0xc9   : > { %515 = vmatpush.bf16.msra.mxu3 %v398_v1 }
  0xcb   : > { %v365_v6 = vpop.permute.xlu0 %364 }
  0xcc   : > { %v370_v27 = vsel %vm368_vm10, %v365_v6, %v367_v54  ;;  %673 = vmatmul.msk.bf16.vlgmr.msra.gmra.mxu3 %vm244_vm6, %v654_v2 }
  0xcd   : > { %v379_v8 = vmul.f32 %v370_v27, %v874_v50  ;;  %v659_v50 = vld [vmem:[%s978_s1 + $0x18] sm:$0xf0] }
  0xce   : > { %v662_v12 = vor.u32 %v681_v11, %v659_v50 }
  0xcf   : > { %v397_v3 = vpack.c.bf16 %v379_v8, %v377_v7 }
  0xd1   : > { %477 = vmatpush.bf16.msra.mxu1 %v397_v3 }
  0xd2   : > { %464 = vmatmul.bf16.gmra.mxu0 %v658_v4 }
  0xd4   : > { %668 = vmatmul.msk.bf16.vlgmr.msra.gmra.mxu1 %vm244_vm6, %v654_v2  ;;  %502 = vmatmul.bf16.gmra.mxu2 %v658_v4 }
  0xdc   : > { %674 = vmatmul.msk.bf16.gmra.mxu3 %vm244_vm6, %v662_v12 }
  0xe4   : > { %669 = vmatmul.msk.bf16.gmra.mxu1 %vm244_vm6, %v662_v12 }
 0x100   : > { %v415_v26 = vpop.permute.xlu2 %414 }
 0x103   : > { %v410_v15 = vpop.permute.xlu1 %409 }
 0x114   : > { %v420_v35 = vpop.permute.xlu0 %419 }
 0x117   : > { %v425_v56 = vpop.permute.xlu1 %424 }
 0x13f   : > { %v460_v13 = vpop.f32.mrf.mxu0 }
 0x140   : > { %v461_v17 = vadd.f32 %v460_v13, %v410_v15 }
 0x147   : > { %v498_v14 = vpop.f32.mrf.mxu2  ;;  %v462_v21 = vpop.f32.mrf.mxu0 }
 0x148   : > { %v499_v16 = vadd.f32 %v498_v14, %v410_v15  ;;  %v463_v33 = vadd.f32 %v462_v21, %v415_v26 }
 0x14f   : > { %v500_v18 = vpop.f32.mrf.mxu2  ;;  %v517_v19 = vpop.f32.mrf.mxu3 }
 0x150   : > { %v518_v20 = vadd.f32 %v517_v19, %v499_v16  ;;  %v501_v30 = vadd.f32 %v500_v18, %v415_v26  ;;  %v465_v41 = vpop.f32.mrf.mxu0 }
 0x151   : > { %v479_v22 = vpop.f32.mrf.mxu1  ;;  %v466_v49 = vadd.f32 %v465_v41, %v420_v35 }
 0x152   : > { %v528_v23 = vsub.f32 0.0, %v518_v20  ;;  %v480_v25 = vadd.f32 %v479_v22, %v461_v17 }
 0x154   : > { %v537_v28 = vmul.f32 1.442695, %v528_v23  ;;  %v527_v29 = vsub.f32 0.0, %v480_v25 }
 0x156   : > { %723 = vpow2.f32 %v537_v28  ;;  %v535_v31 = vmul.f32 1.442695, %v527_v29 }
 0x157   : > { %v519_v32 = vpop.f32.mrf.mxu3  ;;  %v503_v36 = vpop.f32.mrf.mxu2 }
 0x158   : > { %725 = vpow2.f32 %v535_v31  ;;  %v520_v34 = vadd.f32 %v519_v32, %v501_v30  ;;  %v504_v45 = vadd.f32 %v503_v36, %v420_v35  ;;  %v467_v62 = vpop.f32.mrf.mxu0 }
 0x159   : > { %v481_v37 = vpop.f32.mrf.mxu1  ;;  %v468_v8 = vadd.f32 %v467_v62, %v425_v56 }
 0x15a   : > { %v530_v38 = vsub.f32 0.0, %v520_v34  ;;  %v482_v40 = vadd.f32 %v481_v37, %v463_v33 }
 0x15c   : > { %v724_v42 = vpop.eup %723  ;;  %v541_v43 = vmul.f32 1.442695, %v530_v38  ;;  %v529_v44 = vsub.f32 0.0, %v482_v40 }
 0x15d   : > { %v552_v46 = vadd.f32 1.0, %v724_v42 }
 0x15e   : > { %v726_v47 = vpop.eup %725  ;;  %727 = vpow2.f32 %v541_v43  ;;  %v539_v48 = vmul.f32 1.442695, %v529_v44 }
 0x15f   : > { %729 = vrcp.f32 %v552_v46  ;;  %v551_v51 = vadd.f32 1.0, %v726_v47  ;;  %v522_v52 = vpop.f32.mrf.mxu3  ;;  %v505_v24 = vpop.f32.mrf.mxu2 }
 0x160   : > { %731 = vpow2.f32 %v539_v48  ;;  %v523_v53 = vadd.f32 %v522_v52, %v504_v45  ;;  %v506_v1 = vadd.f32 %v505_v24, %v425_v56 }
 0x161   : > { %733 = vrcp.f32 %v551_v51  ;;  %v484_v39 = vpop.f32.mrf.mxu1 }
 0x162   : > { %v532_v54 = vsub.f32 0.0, %v523_v53  ;;  %v485_v55 = vadd.f32 %v484_v39, %v466_v49 }
 0x164   : > { %v728_v57 = vpop.eup %727  ;;  %v545_v58 = vmul.f32 1.442695, %v532_v54  ;;  %v531_v59 = vsub.f32 0.0, %v485_v55 }
 0x165   : > { %v730_v60 = vpop.eup %729  ;;  %v554_v61 = vadd.f32 1.0, %v728_v57 }
 0x166   : > { %v732_v63 = vpop.eup %731  ;;  %v568_v0 = vmul.f32 %v730_v60, %v518_v20  ;;  %735 = vpow2.f32 %v545_v58  ;;  %v543_v2 = vmul.f32 1.442695, %v531_v59 }
 0x167   : > { %v734_v5 = vpop.eup %733  ;;  %737 = vrcp.f32 %v554_v61  ;;  %v553_v6 = vadd.f32 1.0, %v732_v63  ;;  %v524_v27 = vpop.f32.mrf.mxu3 }
 0x168   : > { %576 = vst [vmem:[%s964_s8 + $0x8] sm:$0xff] %v568_v0  ;;  %v567_v7 = vmul.f32 %v734_v5, %v480_v25  ;;  %739 = vpow2.f32 %v543_v2  ;;  %v525_v9 = vadd.f32 %v524_v27, %v506_v1 }
 0x169   : > { %741 = vrcp.f32 %v553_v6  ;;  %v486_v10 = vpop.f32.mrf.mxu1 }
 0x16a   : > { %575 = vst [vmem:[%s964_s8] sm:$0xff] %v567_v7  ;;  %v534_v3 = vsub.f32 0.0, %v525_v9  ;;  %v487_v4 = vadd.f32 %v486_v10, %v468_v8 }
 0x16c   : > { %v736_v11 = vpop.eup %735  ;;  %v549_v50 = vmul.f32 1.442695, %v534_v3  ;;  %v533_v12 = vsub.f32 0.0, %v487_v4 }
 0x16d   : > { %v738_v13 = vpop.eup %737  ;;  %v556_v14 = vadd.f32 1.0, %v736_v11 }
 0x16e   : > { %v740_v15 = vpop.eup %739  ;;  %v570_v16 = vmul.f32 %v738_v13, %v520_v34  ;;  %743 = vpow2.f32 %v549_v50  ;;  %v547_v17 = vmul.f32 1.442695, %v533_v12 }
 0x16f   : > { %v742_v18 = vpop.eup %741  ;;  %745 = vrcp.f32 %v556_v14  ;;  %v555_v19 = vadd.f32 1.0, %v740_v15 }
 0x170   : > { %578 = vst [vmem:[%s964_s8 + $0x18] sm:$0xff] %v570_v16  ;;  %v569_v20 = vmul.f32 %v742_v18, %v482_v40  ;;  %747 = vpow2.f32 %v547_v17 }
 0x171   : > { %749 = vrcp.f32 %v555_v19 }
 0x172   : > { %577 = vst [vmem:[%s964_s8 + $0x10] sm:$0xff] %v569_v20 }
 0x174   : > { %v744_v21 = vpop.eup %743 }
 0x175   : > { %v746_v22 = vpop.eup %745  ;;  %v558_v23 = vadd.f32 1.0, %v744_v21 }
 0x176   : > { %v748_v25 = vpop.eup %747  ;;  %v572_v26 = vmul.f32 %v746_v22, %v523_v53 }
 0x177   : > { %v750_v28 = vpop.eup %749  ;;  %751 = vrcp.f32 %v558_v23  ;;  %v557_v29 = vadd.f32 1.0, %v748_v25 }
 0x178   : > { %580 = vst [vmem:[%s964_s8 + $0x28] sm:$0xff] %v572_v26  ;;  %v571_v30 = vmul.f32 %v750_v28, %v485_v55 }
 0x179   : > { %753 = vrcp.f32 %v557_v29 }
 0x17a   : > { %579 = vst [vmem:[%s964_s8 + $0x20] sm:$0xff] %v571_v30 }
 0x17d   : > { %v752_v31 = vpop.eup %751 }
 0x17e   : > { %v574_v32 = vmul.f32 %v752_v31, %v525_v9 }
 0x17f   : > { %v754_v33 = vpop.eup %753 }
 0x180   : > { %582 = vst [vmem:[%s964_s8 + $0x38] sm:$0xff] %v574_v32  ;;  %v573_v34 = vmul.f32 %v754_v33, %v487_v4 }
 0x182   : > { %581 = vst [vmem:[%s964_s8 + $0x30] sm:$0xff] %v573_v34 }
 0x183 PF: > { %s14_s15 = sadd.s32 1, %s761_s15  }
 0x184   : > { %p11_p4 = scmp.ge.s32.totalorder %s14_s15, 4  }
 0x186   :  { %13 = sbr.rel (!%p11_p4) target bundleno = 1 (0x1), region = 66 }

</bundles_post_ra>
